<compile_context>
chip_gen: v6e
topology: v6e:2x2x1
jax: 0.10.0
libtpu: 0.0.40
codegen_flags: <defaults>
</compile_context>

<pallas_src>
import functools

import jax
import jax.numpy as jnp
from jax.experimental import pallas as pl
from jax.experimental.pallas import tpu as pltpu

_LANE = 128
_TARGET_BLOCK_BYTES = 4 * 1024 * 1024  # per-block bytes (x2 in/out, x2 buffers)


def _frelu_kernel(x_ref, o_ref, *, boundary, tmax):
    x = x_ref[...].astype(jnp.float32)
    b = jnp.float32(boundary)
    two_b = jnp.float32(2.0 * boundary)
    t = jnp.float32(tmax)
    # Faithful to the PyTorch forward (comparison order / strictness preserved):
    #   x = where((2b > x) & (x > b), b, x)
    x = jnp.where((two_b > x) & (x > b), b, x)
    #   x = where((Tmax > x) & (x > 2b), 2, x)
    x = jnp.where((t > x) & (x > two_b), jnp.float32(2.0), x)
    #   x = where(x > Tmax, 0, x); x = where(x < 0, 0, x)
    # Merged into one select: neither 0 nor any intermediate replacement value
    # can satisfy the second condition after the first fires, so this is exact.
    x = jnp.where((x > t) | (x < jnp.float32(0.0)), jnp.float32(0.0), x)
    o_ref[...] = x.astype(o_ref.dtype)


def _frelu_jnp(x, boundary, tmax):
    """Pure-JAX elementwise path (tiny unaligned tails); mirrors the kernel."""
    dtype = x.dtype
    xf = x.astype(jnp.float32)
    b = jnp.float32(boundary)
    two_b = jnp.float32(2.0 * boundary)
    t = jnp.float32(tmax)
    xf = jnp.where((two_b > xf) & (xf > b), b, xf)
    xf = jnp.where((t > xf) & (xf > two_b), jnp.float32(2.0), xf)
    xf = jnp.where((xf > t) | (xf < jnp.float32(0.0)), jnp.float32(0.0), xf)
    return xf.astype(dtype)


def _run_slab(slab, boundary, tmax):
    rows = slab.shape[0]
    itemsize = jnp.dtype(slab.dtype).itemsize
    # Rows per block: multiple of 8 sublanes, ~4 MiB per block.
    target_rows = max(8, (_TARGET_BLOCK_BYTES // (_LANE * itemsize)) // 8 * 8)
    if rows <= target_rows:
        block_rows = rows          # full-extent block (allowed for any rows)
    else:
        block_rows = target_rows   # multiple of 8; ragged last block is masked
    grid = pl.cdiv(rows, block_rows)

    kernel = functools.partial(_frelu_kernel, boundary=boundary, tmax=tmax)
    return pl.pallas_call(
        kernel,
        out_shape=jax.ShapeDtypeStruct(slab.shape, slab.dtype),
        grid_spec=pltpu.PrefetchScalarGridSpec(
            num_scalar_prefetch=0,
            grid=(grid,),
            in_specs=[pl.BlockSpec((block_rows, _LANE), lambda i: (i, 0))],
            out_specs=pl.BlockSpec((block_rows, _LANE), lambda i: (i, 0)),
        ),
        compiler_params=pltpu.CompilerParams(
            dimension_semantics=("parallel",),
            vmem_limit_bytes=48 * 1024 * 1024,
        ),
    )(slab)


def frelu(x, boundary):
    """Elementwise FRelu. x: any shape (e.g. NCHW [N, C, H, W]), float dtype."""
    boundary = float(boundary)
    tmax = boundary * (2.0 ** 64)
    orig_shape = x.shape

    flat = x.reshape(-1)                  # free (contiguous) reshape
    n = flat.shape[0]
    n_aligned = (n // _LANE) * _LANE

    if n_aligned == 0:
        out_flat = _frelu_jnp(flat, boundary, tmax)
    elif n_aligned == n:
        slab = flat.reshape(n // _LANE, _LANE)          # free reshape
        out_flat = _run_slab(slab, boundary, tmax).reshape(-1)
    else:
        # Lane-aligned prefix via the kernel; <128-element tail in plain jnp.
        slab = flat[:n_aligned].reshape(n_aligned // _LANE, _LANE)
        main = _run_slab(slab, boundary, tmax).reshape(-1)
        tail = _frelu_jnp(flat[n_aligned:], boundary, tmax)
        out_flat = jnp.concatenate([main, tail])

    return out_flat.reshape(orig_shape)


def frelu_ref(x, boundary):
    """Pure-JAX reference mirroring the PyTorch forward exactly (f32)."""
    tmax = float(boundary) * (2.0 ** 64)
    b = jnp.float32(boundary)
    x = jnp.where((b * 2 > x) & (x > b), b, x)
    x = jnp.where((jnp.float32(tmax) > x) & (x > b * 2), jnp.float32(2.0), x)
    x = jnp.where(x > jnp.float32(tmax), jnp.float32(0.0), x)
    x = jnp.where(x < 0, jnp.float32(0.0), x)
    return x


if __name__ == "__main__":
    key = jax.random.PRNGKey(0)

    # Main test: NCHW, batch=2, channels=4, spatial=16x16 (lane-aligned path).
    x = jax.random.normal(key, (2, 4, 16, 16), dtype=jnp.float32) * 3.0
    boundary = 1.0
    out = jax.block_until_ready(frelu(x, boundary))
    ref = frelu_ref(x, boundary)
    assert out.shape == x.shape and out.dtype == x.dtype
    assert jnp.allclose(out, ref.astype(x.dtype), atol=0.0, rtol=0.0), "mismatch (aligned)"

    # Secondary test: unaligned total (2*3*5*7 = 210) exercises prefix + tail path.
    key2 = jax.random.PRNGKey(0)
    x2 = jax.random.normal(key2, (2, 3, 5, 7), dtype=jnp.float32) * 3.0
    out2 = jax.block_until_ready(frelu(x2, 0.5))
    ref2 = frelu_ref(x2, 0.5)
    assert out2.shape == x2.shape and out2.dtype == x2.dtype
    assert jnp.allclose(out2, ref2.astype(x2.dtype), atol=0.0, rtol=0.0), "mismatch (ragged)"

    print("KERNEL_OK")
</pallas_src>

<mosaic_0001>
module attributes {stable_mosaic.version = 11 : i64} {
  func.func @_frelu_kernel(%arg0: i32, %arg1: memref<16x128xf32, #tpu.memory_space<vmem>>, %arg2: memref<16x128xf32, #tpu.memory_space<vmem>>) attributes {dimension_semantics = [#tpu.dimension_semantics<parallel>], iteration_bounds = array<i64: 1>, scalar_prefetch = 0 : i64, scratch_operands = 0 : i64, tpu.core_type = #tpu.core_type<tc>, window_params = [{transform_indices = @transform_0, window_bounds = array<i64: 16, 128>}, {transform_indices = @transform_1, window_bounds = array<i64: 16, 128>}]} {
    %c0 = arith.constant 0 : index
    %c0_0 = arith.constant 0 : index
    %0 = vector.load %arg1[%c0, %c0_0] : memref<16x128xf32, #tpu.memory_space<vmem>>, vector<16x128xf32>
    %cst = arith.constant 2.000000e+00 : f32
    %1 = vector.broadcast %cst : f32 to vector<16x128xf32>
    %2 = arith.cmpf ogt, %1, %0 : vector<16x128xf32>
    %cst_1 = arith.constant 1.000000e+00 : f32
    %3 = vector.broadcast %cst_1 : f32 to vector<16x128xf32>
    %4 = arith.cmpf ogt, %0, %3 : vector<16x128xf32>
    %5 = arith.andi %2, %4 : vector<16x128xi1>
    %cst_2 = arith.constant 1.000000e+00 : f32
    %6 = vector.broadcast %cst_2 : f32 to vector<16x128xf32>
    %7 = arith.select %5, %6, %0 : vector<16x128xi1>, vector<16x128xf32>
    %cst_3 = arith.constant 1.84467441E+19 : f32
    %8 = vector.broadcast %cst_3 : f32 to vector<16x128xf32>
    %9 = arith.cmpf ogt, %8, %7 : vector<16x128xf32>
    %cst_4 = arith.constant 2.000000e+00 : f32
    %10 = vector.broadcast %cst_4 : f32 to vector<16x128xf32>
    %11 = arith.cmpf ogt, %7, %10 : vector<16x128xf32>
    %12 = arith.andi %9, %11 : vector<16x128xi1>
    %cst_5 = arith.constant 2.000000e+00 : f32
    %13 = vector.broadcast %cst_5 : f32 to vector<16x128xf32>
    %14 = arith.select %12, %13, %7 : vector<16x128xi1>, vector<16x128xf32>
    %cst_6 = arith.constant 1.84467441E+19 : f32
    %15 = vector.broadcast %cst_6 : f32 to vector<16x128xf32>
    %16 = arith.cmpf ogt, %14, %15 : vector<16x128xf32>
    %cst_7 = arith.constant 0.000000e+00 : f32
    %17 = vector.broadcast %cst_7 : f32 to vector<16x128xf32>
    %18 = arith.cmpf olt, %14, %17 : vector<16x128xf32>
    %19 = arith.ori %16, %18 : vector<16x128xi1>
    %cst_8 = arith.constant 0.000000e+00 : f32
    %20 = vector.broadcast %cst_8 : f32 to vector<16x128xf32>
    %21 = arith.select %19, %20, %14 : vector<16x128xi1>, vector<16x128xf32>
    %c0_9 = arith.constant 0 : index
    %c0_10 = arith.constant 0 : index
    %22 = vector.load %arg2[%c0_9, %c0_10] : memref<16x128xf32, #tpu.memory_space<vmem>>, vector<16x128xf32>
    tpu.vector_store %arg2[%c0_9, %c0_10], %21 {strides = array<i32>} : memref<16x128xf32, #tpu.memory_space<vmem>>, vector<16x128xf32>,
    return
  }
  func.func @transform_0(%arg0: i32) -> (i32, i32) {
    %c0_i32 = arith.constant 0 : i32
    %c0_i32_0 = arith.constant 0 : i32
    return %arg0, %c0_i32 : i32, i32
  }
  func.func @transform_1(%arg0: i32) -> (i32, i32) {
    %c0_i32 = arith.constant 0 : i32
    %c0_i32_0 = arith.constant 0 : i32
    return %arg0, %c0_i32 : i32, i32
  }
}

</mosaic_0001>

<bundles_post_ra>
// kernel: tpu_custom_call.1
= control target key start
LH: loop header
LB: loop body
LE: loop exit
PB: predicated region body
PF: predicated region fallthrough
CT: control target
= control target key end

     0   :  { %6 = vsyncpa [#allocation3], 0  ;;  %s146_s0 = inlined_call_operand.hbm [shape: f32[16,128], index: 0, kind: input, shape index: {}]   ;;  %s147_s1 = inlined_call_operand.hbm [shape: f32[16,128], index: 1, kind: output, shape index: {}]  }
   0x1   :  { %7 = vsyncpa [#allocation4], 0  ;;  %s120_s6 = smov [#allocation2]  }
   0x2   :  { %s13_s7 = sshll.u32 %s120_s6, 4  ;;  %s14_s7 = int_to_ptr.vmem [resolvable:$true] %s13_s7 }
   0x3   :  { %s84_s8 = scalar_lea.vmem %s14_s7, 256  ;;  %p89_p1 = scmp.lt.s32.totalorder %s14_s7, %s14_s7 }
   0x4   :  { %p85_p0 = scmp.ne.s32.totalorder %s14_s7, %s84_s8  ;;  %p90_p2 = scmp.lt.s32.totalorder %s84_s8, %s84_s8 }
   0x6   :  { %p91_p3 = por %p90_p2, %p89_p1 }
   0x8   :  { %p92_p4 = pnand %p91_p3, %p85_p0 }
   0xa   :  { %95 = shalt.err (!%p92_p4)
}
   0xb   :  { %s121_s9 = smov 128   ;;  %s122_s10 = smov 8  }
   0xc   :  { %19 = dma.hbm_to_vmem [thread:$0]  %s146_s0, 256, %s14_s7, [#allocation3], %s121_s9, %s121_s9, %s122_s10  }
   0xd   :  { %116 = dma.done.wait [#allocation3], 256  }
   0xe   :  { %117 = vsyncadd [#allocation3], 4294967040  ;;  %v23_v0 = vld [vmem:[#allocation2] sm:$0xff]  ;;  %v24_v1 = vld [vmem:[#allocation2 + $0x8] sm:$0xff]  ;;  %s123_s0 = smov [#allocation5]  }
   0xf   :  { %vm68_vm0 = vcmp.lt.f32.partialorder %v23_v0, 2.0  ;;  %vm27_vm1 = vcmp.gt.f32.partialorder %v23_v0, 1.0  ;;  %vm69_vm2 = vcmp.lt.f32.partialorder %v24_v1, 2.0  ;;  %vm28_vm3 = vcmp.gt.f32.partialorder %v24_v1, 1.0  ;;  %s56_s13 = sshll.u32 %s123_s0, 4  ;;  %s57_s13 = int_to_ptr.vmem [resolvable:$true] %s56_s13 }
  0x10   :  { %vm29_vm4 = vmand %vm68_vm0, %vm27_vm1  ;;  %s96_s14 = scalar_lea.vmem %s57_s13, 256  ;;  %p101_p6 = scmp.lt.s32.totalorder %s57_s13, %s57_s13 }
  0x11   :  { %v31_v2 = vsel %vm29_vm4, 1.0, %v23_v0  ;;  %vm30_vm5 = vmand %vm69_vm2, %vm28_vm3  ;;  %p97_p5 = scmp.ne.s32.totalorder %s57_s13, %s96_s14  ;;  %p102_p7 = scmp.lt.s32.totalorder %s96_s14, %s96_s14 }
  0x12   :  { %vm70_vm6 = vcmp.lt.f32.partialorder %v31_v2, 1.8446744e+19  ;;  %vm35_vm7 = vcmp.gt.f32.partialorder %v31_v2, 2.0  ;;  %v32_v3 = vsel %vm30_vm5, 1.0, %v24_v1 }
  0x13   :  { %vm37_vm8 = vmand %vm70_vm6, %vm35_vm7  ;;  %vm71_vm9 = vcmp.lt.f32.partialorder %v32_v3, 1.8446744e+19  ;;  %vm36_vm10 = vcmp.gt.f32.partialorder %v32_v3, 2.0  ;;  %p103_p8 = por %p102_p7, %p101_p6 }
  0x14   :  { %v39_v4 = vsel %vm37_vm8, 2.0, %v31_v2  ;;  %vm38_vm11 = vmand %vm71_vm9, %vm36_vm10 }
  0x15   :  { %vm41_vm12 = vcmp.gt.f32.partialorder %v39_v4, 1.8446744e+19  ;;  %vm43_vm13 = vcmp.lt.f32.partialorder %v39_v4, 0.0  ;;  %v40_v5 = vsel %vm38_vm11, 2.0, %v32_v3  ;;  %p104_p9 = pnand %p103_p8, %p97_p5 }
  0x16   :  { %vm45_vm14 = vmor %vm41_vm12, %vm43_vm13  ;;  %vm42_vm15 = vcmp.gt.f32.partialorder %v40_v5, 1.8446744e+19  ;;  %vm44_vm0 = vcmp.lt.f32.partialorder %v40_v5, 0.0 }
  0x17   :  { %v47_v6 = vsel %vm45_vm14, 0.0, %v39_v4  ;;  %vm46_vm1 = vmor %vm42_vm15, %vm44_vm0 }
  0x18   :  { %49 = vst [vmem:[#allocation5] sm:$0xff] %v47_v6  ;;  %v48_v7 = vsel %vm46_vm1, 0.0, %v40_v5 }
  0x19   :  { %50 = vst [vmem:[#allocation5 + $0x8] sm:$0xff] %v48_v7 }
  0x1a   :  { %107 = shalt.err (!%p104_p9)
}
  0x1b   :  { %62 = dma.vmem_to_hbm [thread:$0]  %s57_s13, 256, %s147_s1, [#allocation4], %s121_s9, %s121_s9, %s122_s10  }
  0x1c   :  { %118 = dma.done.wait [#allocation4], 256  }
  0x1d   :  { %119 = vsyncadd [#allocation4], 4294967040 }
  0x1e   :  { %66 = vsyncpa [#allocation3], 1 }
  0x1f   :  { %67 = vsyncpa [#allocation4], 1 }

</bundles_post_ra>
